<compile_context>
chip_gen: v7x
topology: tpu7x:2x2x1
jax: 0.10.0
libtpu: 0.0.40
codegen_flags: <defaults>
</compile_context>

<pallas_src>
import jax
import jax.numpy as jnp
from jax.experimental import pallas as pl
from jax.experimental.pallas import tpu as pltpu


_LEAKY_SLOPE = 0.2


def _round_up(n, m):
    return ((n + m - 1) // m) * m


# ----------------------------------------------------------------------------
# Kernel: fused 3-layer MLP on one batch tile. Matmul operands may be bf16,
# accumulation / bias / LeakyReLU are f32. LeakyReLU(0.2) == max(h, 0.2*h).
# ----------------------------------------------------------------------------
def _decoder_kernel(x_ref, w1_ref, b1_ref, w2_ref, b2_ref, w3_ref, b3_ref,
                    o_ref):
    mm_dtype = w1_ref.dtype

    x = x_ref[...].astype(mm_dtype)

    # Layer 1: Linear(latent -> hidden_p) + LeakyReLU(0.2)
    h = jnp.dot(x, w1_ref[...], preferred_element_type=jnp.float32)
    h = h + b1_ref[...]
    h = jnp.maximum(h, _LEAKY_SLOPE * h)          # single vmax per element

    # Layer 2: Linear(hidden_p -> hidden_p) + LeakyReLU(0.2)
    h = jnp.dot(h.astype(mm_dtype), w2_ref[...],
                preferred_element_type=jnp.float32)
    h = h + b2_ref[...]
    h = jnp.maximum(h, _LEAKY_SLOPE * h)

    # Layer 3: Linear(hidden_p -> output_dim), no activation
    out = jnp.dot(h.astype(mm_dtype), w3_ref[...],
                  preferred_element_type=jnp.float32)
    out = out + b3_ref[...]
    o_ref[...] = out.astype(o_ref.dtype)


# ----------------------------------------------------------------------------
# Capability check for single-buffered (revisited, constant-index) weight
# blocks.  Cheap constructor check only — no extra kernel trace/compile.
# ----------------------------------------------------------------------------
def _check_buffered_support():
    if not hasattr(pl, "Buffered"):
        return False
    try:
        pl.BlockSpec((8, 128), lambda i: (0, 0), pipeline_mode=pl.Buffered(1))
        return True
    except Exception:
        return False


_WEIGHTS_SINGLE_BUFFERED = _check_buffered_support()


# ----------------------------------------------------------------------------
# Parameter preparation (call once, reuse across forward calls).
# ----------------------------------------------------------------------------
def prepare_decoder_params(params, use_bf16_matmul=False):
    """Pad hidden dims to multiples of 128 and cast weights to the matmul dtype.

    Idempotent: calling it on already-prepared params is a no-op (no extra
    pad/convert ops are emitted).  Biases stay f32; the padded hidden columns
    stay exactly zero through bias + LeakyReLU, and the corresponding padded
    rows of the next weight are zero, so results are bit-equivalent in f32.
    """
    w1, b1, w2, b2, w3, b3 = params
    latent_dim = w1.shape[0]
    hidden_dim = w1.shape[1]
    output_dim = w3.shape[-1]
    hidden_p = _round_up(hidden_dim, 128)
    mm_dtype = jnp.bfloat16 if use_bf16_matmul else jnp.float32

    def pad2(a, rows, cols, dtype):
        a = a.reshape(1, -1) if a.ndim == 1 else a
        r, c = a.shape
        if (r, c) != (rows, cols):
            a = jnp.pad(a, ((0, rows - r), (0, cols - c)))
        return a if a.dtype == dtype else a.astype(dtype)

    return (
        pad2(w1, latent_dim, hidden_p, mm_dtype),
        pad2(b1, 1, hidden_p, jnp.float32),
        pad2(w2, hidden_p, hidden_p, mm_dtype),
        pad2(b2, 1, hidden_p, jnp.float32),
        pad2(w3, hidden_p, output_dim, mm_dtype),
        pad2(b3, 1, output_dim, jnp.float32),
    )


# ----------------------------------------------------------------------------
# Forward wrapper.
# ----------------------------------------------------------------------------
def decoder_forward(x, params, *, batch_tile=None, use_bf16_matmul=None):
    """Pallas decoder forward.  x: (B, latent_dim) -> (B, output_dim) in x.dtype.

    `params` may be the raw (w1,b1,w2,b2,w3,b3) tuple or the output of
    prepare_decoder_params (preferred on the hot path — zero prep cost).

    use_bf16_matmul: None -> follow prepared weight dtype, else a model-size
    heuristic (hidden_dim >= 256).  Never depends on batch size, so numerics
    are consistent across calls; pass an explicit bool to pin precision.
    """
    global _WEIGHTS_SINGLE_BUFFERED

    w1 = params[0]
    B, latent_dim = x.shape
    hidden_dim = w1.shape[1]
    output_dim = params[4].shape[-1]
    out_dtype = x.dtype

    if use_bf16_matmul is None:
        use_bf16_matmul = (w1.dtype == jnp.bfloat16) or (hidden_dim >= 256)

    w1p, b1p, w2p, b2p, w3p, b3p = prepare_decoder_params(
        params, use_bf16_matmul=use_bf16_matmul)
    hidden_p = w1p.shape[1]
    matmul_dtype = w1p.dtype

    # ---- batch tile heuristic ------------------------------------------------
    # Whole batch up to 1024 rows (per-grid-step overhead dominates); otherwise
    # 1024-2048 rows with >= 4 grid steps so both v7x TensorCores get >= 2
    # steps each and input/output DMAs pipeline against the matmuls.
    row_align = 16 if matmul_dtype == jnp.bfloat16 else 8
    if batch_tile is None:
        if B <= 1024:
            batch_tile = B
        else:
            batch_tile = min(2048, max(1024, _round_up(pl.cdiv(B, 4), row_align)))
    if batch_tile >= B:
        batch_tile = B                      # block == full dim: always legal
    else:
        batch_tile = max(row_align, _round_up(batch_tile, row_align))
        if batch_tile >= B:
            batch_tile = B

    grid = (pl.cdiv(B, batch_tile),)        # partial last block handled by Pallas

    # ---- VMEM budget -----------------------------------------------------------
    w_isz = jnp.dtype(matmul_dtype).itemsize
    weight_bytes = ((latent_dim * hidden_p + hidden_p * hidden_p
                     + hidden_p * output_dim) * w_isz
                    + (2 * hidden_p + output_dim) * 4)          # f32 biases
    io_bytes = 2 * batch_tile * (latent_dim * x.dtype.itemsize
                                 + output_dim * jnp.dtype(out_dtype).itemsize)
    act_bytes = 2 * batch_tile * hidden_p * 4                   # f32 intermediates
    try:
        vmem_cap = int(pltpu.get_tpu_info().vmem_capacity_bytes)
    except Exception:
        vmem_cap = 64 << 20                 # conservative (v7x per-TC)
    vmem_ceiling = max(vmem_cap - (8 << 20), 16 << 20)

    def build_and_run(single_buffer_weights):
        if single_buffer_weights:
            # Constant-index (revisited) weight blocks: one buffer, no wasted VMEM.
            def wspec(shape):
                return pl.BlockSpec(shape, lambda i: (0, 0),
                                    pipeline_mode=pl.Buffered(1))
            w_bufs = 1
        else:
            def wspec(shape):
                return pl.BlockSpec(shape, lambda i: (0, 0))
            w_bufs = 2
        need = w_bufs * weight_bytes + io_bytes + act_bytes + (4 << 20)
        vmem_limit = int(min(max(need, 16 << 20), vmem_ceiling))

        return pl.pallas_call(
            _decoder_kernel,
            out_shape=jax.ShapeDtypeStruct((B, output_dim), out_dtype),
            grid_spec=pltpu.PrefetchScalarGridSpec(
                num_scalar_prefetch=0,
                grid=grid,
                in_specs=[
                    pl.BlockSpec((batch_tile, latent_dim), lambda i: (i, 0)),  # x
                    wspec((latent_dim, hidden_p)),   # w1
                    wspec((1, hidden_p)),            # b1
                    wspec((hidden_p, hidden_p)),     # w2
                    wspec((1, hidden_p)),            # b2
                    wspec((hidden_p, output_dim)),   # w3
                    wspec((1, output_dim)),          # b3
                ],
                out_specs=pl.BlockSpec((batch_tile, output_dim),
                                       lambda i: (i, 0)),
            ),
            compiler_params=pltpu.CompilerParams(
                dimension_semantics=("parallel",),
                vmem_limit_bytes=vmem_limit),
        )(x, w1p, b1p, w2p, b2p, w3p, b3p)

    if _WEIGHTS_SINGLE_BUFFERED:
        try:
            return build_and_run(True)
        except Exception:
            # Buffered(1) not lowerable in this build: remember the decision so
            # we never re-trace twice again; fall back to default (double-
            # buffered) weight blocks, which are functionally identical.
            _WEIGHTS_SINGLE_BUFFERED = False
    return build_and_run(False)


# ----------------------------------------------------------------------------
# Init + pure-JAX reference (for correctness checking).
# ----------------------------------------------------------------------------
def init_decoder_params(key, output_dim, hidden_dim, latent_dim,
                        dtype=jnp.float32):
    """Mimics nn.Linear default init U(-1/sqrt(fan_in), 1/sqrt(fan_in))."""
    ks = jax.random.split(key, 6)

    def linear(kw, kb, fan_in, fan_out):
        bound = 1.0 / jnp.sqrt(fan_in)
        w = jax.random.uniform(kw, (fan_in, fan_out), dtype, -bound, bound)
        b = jax.random.uniform(kb, (1, fan_out), dtype, -bound, bound)
        return w, b

    w1, b1 = linear(ks[0], ks[1], latent_dim, hidden_dim)
    w2, b2 = linear(ks[2], ks[3], hidden_dim, hidden_dim)
    w3, b3 = linear(ks[4], ks[5], hidden_dim, output_dim)
    return (w1, b1, w2, b2, w3, b3)


def decoder_reference(x, params):
    w1, b1, w2, b2, w3, b3 = params
    leaky = lambda v: jnp.where(v > 0, v, 0.2 * v)
    h = leaky(x @ w1 + b1)
    h = leaky(h @ w2 + b2)
    return h @ w3 + b3


if __name__ == "__main__":
    key = jax.random.PRNGKey(0)
    k_x, k_p, k_x2, k_p2 = jax.random.split(key, 4)

    # ---- Case 1: tiny, pure f32, single grid step ---------------------------
    B1, L1, H1, O1 = 8, 16, 32, 64
    x1 = jax.random.normal(k_x, (B1, L1), dtype=jnp.float32)
    p1 = init_decoder_params(k_p, O1, H1, L1)

    out1 = jax.block_until_ready(decoder_forward(x1, p1))
    ref1 = decoder_reference(x1, p1)
    assert out1.shape == (B1, O1)
    assert jnp.allclose(out1, ref1, atol=1e-5, rtol=1e-5), \
        float(jnp.max(jnp.abs(out1 - ref1)))

    # ---- Case 2: multi-step grid with partial last block, bf16 MXU operands,
    #      params prepared once and reused (zero prep cost on the call) -------
    B2, L2, H2, O2 = 200, 24, 256, 300
    x2 = jax.random.normal(k_x2, (B2, L2), dtype=jnp.float32)
    raw2 = init_decoder_params(k_p2, O2, H2, L2)
    prepared2 = prepare_decoder_params(raw2, use_bf16_matmul=True)

    out2 = jax.block_until_ready(
        decoder_forward(x2, prepared2, batch_tile=64))   # grid=4, ragged tail
    ref2 = decoder_reference(x2, raw2)
    assert out2.shape == (B2, O2)
    rel_err = jnp.max(jnp.abs(out2 - ref2)) / (jnp.max(jnp.abs(ref2)) + 1e-6)
    assert rel_err < 5e-2, float(rel_err)

    print("KERNEL_OK")
</pallas_src>

<mosaic_0001>
module attributes {stable_mosaic.version = 11 : i64} {
  func.func @_decoder_kernel(%arg0: i32, %arg1: memref<8x16xf32, #tpu.memory_space<vmem>>, %arg2: memref<16x128xf32, #tpu.memory_space<vmem>>, %arg3: memref<1x128xf32, #tpu.memory_space<vmem>>, %arg4: memref<128x128xf32, #tpu.memory_space<vmem>>, %arg5: memref<1x128xf32, #tpu.memory_space<vmem>>, %arg6: memref<128x64xf32, #tpu.memory_space<vmem>>, %arg7: memref<1x64xf32, #tpu.memory_space<vmem>>, %arg8: memref<8x64xf32, #tpu.memory_space<vmem>>) attributes {dimension_semantics = [#tpu.dimension_semantics<parallel>], iteration_bounds = array<i64: 1>, scalar_prefetch = 0 : i64, scratch_operands = 0 : i64, tpu.core_type = #tpu.core_type<tc>, window_params = [{transform_indices = @transform_0, window_bounds = array<i64: 8, 16>}, {pipeline_mode = #tpu.pipeline_mode<synchronous>, transform_indices = @transform_1, window_bounds = array<i64: 16, 128>}, {pipeline_mode = #tpu.pipeline_mode<synchronous>, transform_indices = @transform_2, window_bounds = array<i64: 1, 128>}, {pipeline_mode = #tpu.pipeline_mode<synchronous>, transform_indices = @transform_3, window_bounds = array<i64: 128, 128>}, {pipeline_mode = #tpu.pipeline_mode<synchronous>, transform_indices = @transform_4, window_bounds = array<i64: 1, 128>}, {pipeline_mode = #tpu.pipeline_mode<synchronous>, transform_indices = @transform_5, window_bounds = array<i64: 128, 64>}, {pipeline_mode = #tpu.pipeline_mode<synchronous>, transform_indices = @transform_6, window_bounds = array<i64: 1, 64>}, {transform_indices = @transform_7, window_bounds = array<i64: 8, 64>}]} {
    %c0 = arith.constant 0 : index
    %c0_0 = arith.constant 0 : index
    %0 = vector.load %arg1[%c0, %c0_0] : memref<8x16xf32, #tpu.memory_space<vmem>>, vector<8x16xf32>
    %c0_1 = arith.constant 0 : index
    %c0_2 = arith.constant 0 : index
    %1 = vector.load %arg2[%c0_1, %c0_2] : memref<16x128xf32, #tpu.memory_space<vmem>>, vector<16x128xf32>
    %cst = arith.constant dense<0.000000e+00> : vector<8x128xf32>
    %2 = tpu.matmul %0, %1, %cst {dimension_numbers = #tpu.dot_dimension_numbers<[1], [0], [0], [1], [0, 0, 1, 1], [], []>} : vector<8x16xf32>, vector<16x128xf32>, vector<8x128xf32> -> vector<8x128xf32>
    %c0_3 = arith.constant 0 : index
    %c0_4 = arith.constant 0 : index
    %3 = vector.load %arg3[%c0_3, %c0_4] : memref<1x128xf32, #tpu.memory_space<vmem>>, vector<1x128xf32>
    %4 = vector.broadcast %3 : vector<1x128xf32> to vector<8x128xf32>
    %5 = arith.addf %2, %4 : vector<8x128xf32>
    %cst_5 = arith.constant 2.000000e-01 : f32
    %6 = vector.broadcast %cst_5 : f32 to vector<8x128xf32>
    %7 = arith.mulf %6, %5 : vector<8x128xf32>
    %8 = arith.maximumf %5, %7 : vector<8x128xf32>
    %c0_6 = arith.constant 0 : index
    %c0_7 = arith.constant 0 : index
    %9 = vector.load %arg4[%c0_6, %c0_7] : memref<128x128xf32, #tpu.memory_space<vmem>>, vector<128x128xf32>
    %cst_8 = arith.constant dense<0.000000e+00> : vector<8x128xf32>
    %10 = tpu.matmul %8, %9, %cst_8 {dimension_numbers = #tpu.dot_dimension_numbers<[1], [0], [0], [1], [0, 0, 1, 1], [], []>} : vector<8x128xf32>, vector<128x128xf32>, vector<8x128xf32> -> vector<8x128xf32>
    %c0_9 = arith.constant 0 : index
    %c0_10 = arith.constant 0 : index
    %11 = vector.load %arg5[%c0_9, %c0_10] : memref<1x128xf32, #tpu.memory_space<vmem>>, vector<1x128xf32>
    %12 = vector.broadcast %11 : vector<1x128xf32> to vector<8x128xf32>
    %13 = arith.addf %10, %12 : vector<8x128xf32>
    %cst_11 = arith.constant 2.000000e-01 : f32
    %14 = vector.broadcast %cst_11 : f32 to vector<8x128xf32>
    %15 = arith.mulf %14, %13 : vector<8x128xf32>
    %16 = arith.maximumf %13, %15 : vector<8x128xf32>
    %c0_12 = arith.constant 0 : index
    %c0_13 = arith.constant 0 : index
    %17 = vector.load %arg6[%c0_12, %c0_13] : memref<128x64xf32, #tpu.memory_space<vmem>>, vector<128x64xf32>
    %cst_14 = arith.constant dense<0.000000e+00> : vector<8x64xf32>
    %18 = tpu.matmul %16, %17, %cst_14 {dimension_numbers = #tpu.dot_dimension_numbers<[1], [0], [0], [1], [0, 0, 1, 1], [], []>} : vector<8x128xf32>, vector<128x64xf32>, vector<8x64xf32> -> vector<8x64xf32>
    %c0_15 = arith.constant 0 : index
    %c0_16 = arith.constant 0 : index
    %19 = vector.load %arg7[%c0_15, %c0_16] : memref<1x64xf32, #tpu.memory_space<vmem>>, vector<1x64xf32>
    %20 = vector.broadcast %19 : vector<1x64xf32> to vector<8x64xf32>
    %21 = arith.addf %18, %20 : vector<8x64xf32>
    %c0_17 = arith.constant 0 : index
    %c0_18 = arith.constant 0 : index
    %22 = vector.load %arg8[%c0_17, %c0_18] : memref<8x64xf32, #tpu.memory_space<vmem>>, vector<8x64xf32>
    tpu.vector_store %arg8[%c0_17, %c0_18], %21 {strides = array<i32>} : memref<8x64xf32, #tpu.memory_space<vmem>>, vector<8x64xf32>,
    return
  }
  func.func @transform_0(%arg0: i32) -> (i32, i32) {
    %c0_i32 = arith.constant 0 : i32
    %c0_i32_0 = arith.constant 0 : i32
    return %arg0, %c0_i32 : i32, i32
  }
  func.func @transform_1(%arg0: i32) -> (i32, i32) {
    %c0_i32 = arith.constant 0 : i32
    %c0_i32_0 = arith.constant 0 : i32
    %c0_i32_1 = arith.constant 0 : i32
    return %c0_i32, %c0_i32_0 : i32, i32
  }
  func.func @transform_2(%arg0: i32) -> (i32, i32) {
    %c0_i32 = arith.constant 0 : i32
    %c0_i32_0 = arith.constant 0 : i32
    %c0_i32_1 = arith.constant 0 : i32
    return %c0_i32, %c0_i32_0 : i32, i32
  }
  func.func @transform_3(%arg0: i32) -> (i32, i32) {
    %c0_i32 = arith.constant 0 : i32
    %c0_i32_0 = arith.constant 0 : i32
    %c0_i32_1 = arith.constant 0 : i32
    return %c0_i32, %c0_i32_0 : i32, i32
  }
  func.func @transform_4(%arg0: i32) -> (i32, i32) {
    %c0_i32 = arith.constant 0 : i32
    %c0_i32_0 = arith.constant 0 : i32
    %c0_i32_1 = arith.constant 0 : i32
    return %c0_i32, %c0_i32_0 : i32, i32
  }
  func.func @transform_5(%arg0: i32) -> (i32, i32) {
    %c0_i32 = arith.constant 0 : i32
    %c0_i32_0 = arith.constant 0 : i32
    %c0_i32_1 = arith.constant 0 : i32
    return %c0_i32, %c0_i32_0 : i32, i32
  }
  func.func @transform_6(%arg0: i32) -> (i32, i32) {
    %c0_i32 = arith.constant 0 : i32
    %c0_i32_0 = arith.constant 0 : i32
    %c0_i32_1 = arith.constant 0 : i32
    return %c0_i32, %c0_i32_0 : i32, i32
  }
  func.func @transform_7(%arg0: i32) -> (i32, i32) {
    %c0_i32 = arith.constant 0 : i32
    %c0_i32_0 = arith.constant 0 : i32
    return %arg0, %c0_i32 : i32, i32
  }
}

module attributes {stable_mosaic.version = 11 : i64} {
  func.func @_decoder_kernel(%arg0: i32, %arg1: memref<8x16xf32, #tpu.memory_space<vmem>>, %arg2: memref<16x128xf32, #tpu.memory_space<vmem>>, %arg3: memref<1x128xf32, #tpu.memory_space<vmem>>, %arg4: memref<128x128xf32, #tpu.memory_space<vmem>>, %arg5: memref<1x128xf32, #tpu.memory_space<vmem>>, %arg6: memref<128x64xf32, #tpu.memory_space<vmem>>, %arg7: memref<1x64xf32, #tpu.memory_space<vmem>>, %arg8: memref<8x64xf32, #tpu.memory_space<vmem>>) attributes {dimension_semantics = [#tpu.dimension_semantics<parallel>], iteration_bounds = array<i64: 1>, scalar_prefetch = 0 : i64, scratch_operands = 0 : i64, tpu.core_type = #tpu.core_type<tc>, window_params = [{transform_indices = @transform_0, window_bounds = array<i64: 8, 16>}, {pipeline_mode = #tpu.pipeline_mode<synchronous>, transform_indices = @transform_1, window_bounds = array<i64: 16, 128>}, {pipeline_mode = #tpu.pipeline_mode<synchronous>, transform_indices = @transform_2, window_bounds = array<i64: 1, 128>}, {pipeline_mode = #tpu.pipeline_mode<synchronous>, transform_indices = @transform_3, window_bounds = array<i64: 128, 128>}, {pipeline_mode = #tpu.pipeline_mode<synchronous>, transform_indices = @transform_4, window_bounds = array<i64: 1, 128>}, {pipeline_mode = #tpu.pipeline_mode<synchronous>, transform_indices = @transform_5, window_bounds = array<i64: 128, 64>}, {pipeline_mode = #tpu.pipeline_mode<synchronous>, transform_indices = @transform_6, window_bounds = array<i64: 1, 64>}, {transform_indices = @transform_7, window_bounds = array<i64: 8, 64>}]} {
    %c0 = arith.constant 0 : index
    %c0_0 = arith.constant 0 : index
    %0 = vector.load %arg1[%c0, %c0_0] : memref<8x16xf32, #tpu.memory_space<vmem>>, vector<8x16xf32>
    %c0_1 = arith.constant 0 : index
    %c0_2 = arith.constant 0 : index
    %1 = vector.load %arg2[%c0_1, %c0_2] : memref<16x128xf32, #tpu.memory_space<vmem>>, vector<16x128xf32>
    %cst = arith.constant dense<0.000000e+00> : vector<8x128xf32>
    %2 = tpu.matmul %0, %1, %cst {dimension_numbers = #tpu.dot_dimension_numbers<[1], [0], [0], [1], [0, 0, 1, 1], [], []>} : vector<8x16xf32>, vector<16x128xf32>, vector<8x128xf32> -> vector<8x128xf32>
    %c0_3 = arith.constant 0 : index
    %c0_4 = arith.constant 0 : index
    %3 = vector.load %arg3[%c0_3, %c0_4] : memref<1x128xf32, #tpu.memory_space<vmem>>, vector<1x128xf32>
    %4 = vector.broadcast %3 : vector<1x128xf32> to vector<8x128xf32>
    %5 = arith.addf %2, %4 : vector<8x128xf32>
    %cst_5 = arith.constant 2.000000e-01 : f32
    %6 = vector.broadcast %cst_5 : f32 to vector<8x128xf32>
    %7 = arith.mulf %6, %5 : vector<8x128xf32>
    %8 = arith.maximumf %5, %7 : vector<8x128xf32>
    %c0_6 = arith.constant 0 : index
    %c0_7 = arith.constant 0 : index
    %9 = vector.load %arg4[%c0_6, %c0_7] : memref<128x128xf32, #tpu.memory_space<vmem>>, vector<128x128xf32>
    %cst_8 = arith.constant dense<0.000000e+00> : vector<8x128xf32>
    %10 = tpu.matmul %8, %9, %cst_8 {dimension_numbers = #tpu.dot_dimension_numbers<[1], [0], [0], [1], [0, 0, 1, 1], [], []>} : vector<8x128xf32>, vector<128x128xf32>, vector<8x128xf32> -> vector<8x128xf32>
    %c0_9 = arith.constant 0 : index
    %c0_10 = arith.constant 0 : index
    %11 = vector.load %arg5[%c0_9, %c0_10] : memref<1x128xf32, #tpu.memory_space<vmem>>, vector<1x128xf32>
    %12 = vector.broadcast %11 : vector<1x128xf32> to vector<8x128xf32>
    %13 = arith.addf %10, %12 : vector<8x128xf32>
    %cst_11 = arith.constant 2.000000e-01 : f32
    %14 = vector.broadcast %cst_11 : f32 to vector<8x128xf32>
    %15 = arith.mulf %14, %13 : vector<8x128xf32>
    %16 = arith.maximumf %13, %15 : vector<8x128xf32>
    %c0_12 = arith.constant 0 : index
    %c0_13 = arith.constant 0 : index
    %17 = vector.load %arg6[%c0_12, %c0_13] : memref<128x64xf32, #tpu.memory_space<vmem>>, vector<128x64xf32>
    %cst_14 = arith.constant dense<0.000000e+00> : vector<8x64xf32>
    %18 = tpu.matmul %16, %17, %cst_14 {dimension_numbers = #tpu.dot_dimension_numbers<[1], [0], [0], [1], [0, 0, 1, 1], [], []>} : vector<8x128xf32>, vector<128x64xf32>, vector<8x64xf32> -> vector<8x64xf32>
    %c0_15 = arith.constant 0 : index
    %c0_16 = arith.constant 0 : index
    %19 = vector.load %arg7[%c0_15, %c0_16] : memref<1x64xf32, #tpu.memory_space<vmem>>, vector<1x64xf32>
    %20 = vector.broadcast %19 : vector<1x64xf32> to vector<8x64xf32>
    %21 = arith.addf %18, %20 : vector<8x64xf32>
    %c0_17 = arith.constant 0 : index
    %c0_18 = arith.constant 0 : index
    %22 = vector.load %arg8[%c0_17, %c0_18] : memref<8x64xf32, #tpu.memory_space<vmem>>, vector<8x64xf32>
    tpu.vector_store %arg8[%c0_17, %c0_18], %21 {strides = array<i32>} : memref<8x64xf32, #tpu.memory_space<vmem>>, vector<8x64xf32>,
    return
  }
  func.func @transform_0(%arg0: i32) -> (i32, i32) {
    %c0_i32 = arith.constant 0 : i32
    %c0_i32_0 = arith.constant 0 : i32
    return %arg0, %c0_i32 : i32, i32
  }
  func.func @transform_1(%arg0: i32) -> (i32, i32) {
    %c0_i32 = arith.constant 0 : i32
    %c0_i32_0 = arith.constant 0 : i32
    %c0_i32_1 = arith.constant 0 : i32
    return %c0_i32, %c0_i32_0 : i32, i32
  }
  func.func @transform_2(%arg0: i32) -> (i32, i32) {
    %c0_i32 = arith.constant 0 : i32
    %c0_i32_0 = arith.constant 0 : i32
    %c0_i32_1 = arith.constant 0 : i32
    return %c0_i32, %c0_i32_0 : i32, i32
  }
  func.func @transform_3(%arg0: i32) -> (i32, i32) {
    %c0_i32 = arith.constant 0 : i32
    %c0_i32_0 = arith.constant 0 : i32
    %c0_i32_1 = arith.constant 0 : i32
    return %c0_i32, %c0_i32_0 : i32, i32
  }
  func.func @transform_4(%arg0: i32) -> (i32, i32) {
    %c0_i32 = arith.constant 0 : i32
    %c0_i32_0 = arith.constant 0 : i32
    %c0_i32_1 = arith.constant 0 : i32
    return %c0_i32, %c0_i32_0 : i32, i32
  }
  func.func @transform_5(%arg0: i32) -> (i32, i32) {
    %c0_i32 = arith.constant 0 : i32
    %c0_i32_0 = arith.constant 0 : i32
    %c0_i32_1 = arith.constant 0 : i32
    return %c0_i32, %c0_i32_0 : i32, i32
  }
  func.func @transform_6(%arg0: i32) -> (i32, i32) {
    %c0_i32 = arith.constant 0 : i32
    %c0_i32_0 = arith.constant 0 : i32
    %c0_i32_1 = arith.constant 0 : i32
    return %c0_i32, %c0_i32_0 : i32, i32
  }
  func.func @transform_7(%arg0: i32) -> (i32, i32) {
    %c0_i32 = arith.constant 0 : i32
    %c0_i32_0 = arith.constant 0 : i32
    return %arg0, %c0_i32 : i32, i32
  }
}

</mosaic_0001>

<bundles_post_ra>
// kernel: tpu_custom_call.1
= control target key start
LH: loop header
LB: loop body
LE: loop exit
PB: predicated region body
PF: predicated region fallthrough
CT: control target
= control target key end

     0   :  { %v514_v2 = vmov 0.0|0.0   ;;  %vm515_vm0 = vmmov 0   ;;  %v516_v4 = vmov 0.0   ;;  %vm37_vm1 = vcmask 130048   ;;  %s704_s0 = inlined_call_operand.vmem [shape: f32[8,16], index: 0, kind: input, shape index: {}]   ;;  %s705_s1 = inlined_call_operand.vmem [shape: f32[16,128], index: 1, kind: input, shape index: {}]   ;;  %s706_s2 = inlined_call_operand.vmem [shape: f32[1,128], index: 2, kind: input, shape index: {}]   ;;  %s707_s3 = inlined_call_operand.vmem [shape: f32[128,128], index: 3, kind: input, shape index: {}]   ;;  %s708_s4 = inlined_call_operand.vmem [shape: f32[1,128], index: 4, kind: input, shape index: {}]   ;;  %s709_s5 = inlined_call_operand.vmem [shape: f32[128,64], index: 5, kind: input, shape index: {}]   ;;  %s710_s6 = inlined_call_operand.vmem [shape: f32[1,64], index: 6, kind: input, shape index: {}]   ;;  %s711_s7 = inlined_call_operand.hbm [shape: f32[8,64], index: 7, kind: output, shape index: {}]  }
   0x1   :  { %v28_v0 = vld [vmem:[%s705_s1] sm:$0xff]  ;;  %v29_v1 = vld [vmem:[%s705_s1 + $0x8] sm:$0xff]  ;;  %435 = vmatprep.subr.bf16.mxu0 %v514_v2  ;;  %362 = vmatprep.mubr.msk.f32.mxu0 %vm515_vm0, %v516_v4  ;;  %v115_v7 = vld [vmem:[%s707_s3 + $0x10] sm:$0xff] }
   0x2   :  { %v436_v3 = vpack.c.bf16 %v29_v1, %v28_v0  ;;  %v113_v5 = vld [vmem:[%s707_s3] sm:$0xff]  ;;  %v114_v6 = vld [vmem:[%s707_s3 + $0x8] sm:$0xff]  ;;  %438 = vmatprep.subr.bf16.mxu1 %v514_v2  ;;  %v116_v9 = vld [vmem:[%s707_s3 + $0x18] sm:$0xff]  ;;  %397 = vmatprep.mubr.msk.f32.mxu1 %vm515_vm0, %v516_v4 }
   0x3   :  { %v439_v8 = vpack.c.bf16 %v114_v6, %v113_v5  ;;  %v27_v10 = vld [vmem:[%s704_s0] sm:$0xff]  ;;  %v442_v11 = vpack.c.bf16 %v116_v9, %v115_v7  ;;  %v118_v13 = vld [vmem:[%s707_s3 + $0x28] sm:$0xff] }
   0x4   :  { %437 = vmatpush3.bf16.msra.mxu0 %v436_v3  ;;  %v117_v12 = vld [vmem:[%s707_s3 + $0x20] sm:$0xff] }
   0x5   :  { %440 = vmatpush3.bf16.msra.mxu1 %v439_v8  ;;  %462 = vmatprep.subr.bf16.mxu0 %v514_v2 }
   0x6   :  { %441 = vmatprep.subr.bf16.mxu1 %v514_v2 }
   0x7   :  { %12 = vsyncpa [#allocation3], 0  ;;  %363 = vmatmul.mubr.msk.f32.vlgmr.msra.gmra.mrb[0].mxu0 %vm37_vm1, %v27_v10  ;;  %v445_v14 = vpack.c.bf16 %v118_v13, %v117_v12  ;;  %v119_v15 = vld [vmem:[%s707_s3 + $0x30] sm:$0xff]  ;;  %v120_v16 = vld [vmem:[%s707_s3 + $0x38] sm:$0xff]  ;;  %s517_s22 = smov [#allocation2]   ;;  %vm301_vm2 = vcmask 523264  }
   0x8   :  { %432 = vmatprep.mubr.msk.f32.mxu0 %vm515_vm0, %v516_v4  ;;  %v448_v17 = vpack.c.bf16 %v120_v16, %v119_v15  ;;  %v121_v18 = vld [vmem:[%s707_s3 + $0x40] sm:$0xff]  ;;  %v122_v19 = vld [vmem:[%s707_s3 + $0x48] sm:$0xff]  ;;  %v123_v21 = vld [vmem:[%s707_s3 + $0x50] sm:$0xff]  ;;  %s309_s23 = sshll.u32 %s517_s22, 4  ;;  %s310_s23 = int_to_ptr.vmem [resolvable:$true] %s309_s23 }
   0x9   :  { %443 = vmatpush3.bf16.msra.mxu1 %v442_v11  ;;  %v451_v20 = vpack.c.bf16 %v122_v19, %v121_v18  ;;  %v124_v22 = vld [vmem:[%s707_s3 + $0x58] sm:$0xff]  ;;  %v125_v24 = vld [vmem:[%s707_s3 + $0x60] sm:$0xff]  ;;  %v126_v25 = vld [vmem:[%s707_s3 + $0x68] sm:$0xff]  ;;  %p495_p1 = scmp.lt.s32.totalorder %s310_s23, %s310_s23 }
   0xa   :  { %444 = vmatprep.subr.bf16.mxu1 %v514_v2  ;;  %v454_v23 = vpack.c.bf16 %v124_v22, %v123_v21  ;;  %v457_v26 = vpack.c.bf16 %v126_v25, %v125_v24  ;;  %v127_v27 = vld [vmem:[%s707_s3 + $0x70] sm:$0xff]  ;;  %v128_v28 = vld [vmem:[%s707_s3 + $0x78] sm:$0xff]  ;;  %v208_v30 = vld [vmem:[%s709_s5] sm:$0xff] }
   0xb   :  { %v460_v29 = vpack.c.bf16 %v128_v28, %v127_v27  ;;  %v209_v31 = vld [vmem:[%s709_s5 + $0x8] sm:$0xff]  ;;  %v210_v32 = vld [vmem:[%s709_s5 + $0x10] sm:$0xff]  ;;  %v211_v34 = vld [vmem:[%s709_s5 + $0x18] sm:$0xff] }
   0xc   :  { %v463_v33 = vpack.c.bf16 %v209_v31, %v208_v30  ;;  %v466_v35 = vpack.c.bf16 %v211_v34, %v210_v32  ;;  %v212_v36 = vld [vmem:[%s709_s5 + $0x20] sm:$0xff]  ;;  %v213_v37 = vld [vmem:[%s709_s5 + $0x28] sm:$0xff]  ;;  %v214_v39 = vld [vmem:[%s709_s5 + $0x30] sm:$0xff] }
   0xd   :  { %446 = vmatpush3.bf16.msra.mxu1 %v445_v14  ;;  %v469_v38 = vpack.c.bf16 %v213_v37, %v212_v36  ;;  %v215_v40 = vld [vmem:[%s709_s5 + $0x38] sm:$0xff]  ;;  %v216_v42 = vld [vmem:[%s709_s5 + $0x40] sm:$0xff]  ;;  %v217_v43 = vld [vmem:[%s709_s5 + $0x48] sm:$0xff] }
   0xe   :  { %447 = vmatprep.subr.bf16.mxu1 %v514_v2  ;;  %464 = vmatpush3.bf16.msra.mxu0 %v463_v33  ;;  %v472_v41 = vpack.c.bf16 %v215_v40, %v214_v39  ;;  %v475_v44 = vpack.c.bf16 %v217_v43, %v216_v42  ;;  %v218_v45 = vld [vmem:[%s709_s5 + $0x50] sm:$0xff]  ;;  %v219_v46 = vld [vmem:[%s709_s5 + $0x58] sm:$0xff]  ;;  %v317_v48 = vld [vmem:[%s706_s2] ss:$0 sm:$0xff] }
   0xf   :  { %465 = vmatprep.subr.bf16.mxu0 %v514_v2  ;;  %v478_v47 = vpack.c.bf16 %v219_v46, %v218_v45  ;;  %v220_v54 = vld [vmem:[%s709_s5 + $0x60] sm:$0xff]  ;;  %v221_v55 = vld [vmem:[%s709_s5 + $0x68] sm:$0xff]  ;;  %v222_v57 = vld [vmem:[%s709_s5 + $0x70] sm:$0xff] }
  0x10   :  { %v481_v56 = vpack.c.bf16 %v221_v55, %v220_v54  ;;  %v223_v58 = vld [vmem:[%s709_s5 + $0x78] sm:$0xff]  ;;  %v319_v60 = vld [vmem:[%s708_s4] ss:$0 sm:$0xff]  ;;  %s490_s5 = scalar_lea.vmem %s310_s23, 128 }
  0x11   :  { %449 = vmatpush3.bf16.msra.mxu1 %v448_v17  ;;  %v484_v59 = vpack.c.bf16 %v223_v58, %v222_v57  ;;  %p491_p0 = scmp.ne.s32.totalorder %s310_s23, %s490_s5  ;;  %p496_p2 = scmp.lt.s32.totalorder %s490_s5, %s490_s5 }
  0x12   :  { %450 = vmatprep.subr.bf16.mxu1 %v514_v2  ;;  %467 = vmatpush3.bf16.msra.mxu0 %v466_v35 }
  0x13   :  { %468 = vmatprep.subr.bf16.mxu0 %v514_v2  ;;  %p497_p3 = por %p496_p2, %p495_p1 }
  0x15   :  { %452 = vmatpush3.bf16.msra.mxu1 %v451_v20  ;;  %p498_p4 = pnand %p497_p3, %p491_p0 }
  0x16   :  { %453 = vmatprep.subr.bf16.mxu1 %v514_v2  ;;  %470 = vmatpush3.bf16.msra.mxu0 %v469_v38 }
  0x17   :  { %471 = vmatprep.subr.bf16.mxu0 %v514_v2 }
  0x19   :  { %455 = vmatpush3.bf16.msra.mxu1 %v454_v23 }
  0x1a   :  { %456 = vmatprep.subr.bf16.mxu1 %v514_v2  ;;  %473 = vmatpush3.bf16.msra.mxu0 %v472_v41 }
  0x1b   :  { %474 = vmatprep.subr.bf16.mxu0 %v514_v2 }
  0x1d   :  { %458 = vmatpush3.bf16.msra.mxu1 %v457_v26 }
  0x1e   :  { %459 = vmatprep.subr.bf16.mxu1 %v514_v2  ;;  %476 = vmatpush3.bf16.msra.mxu0 %v475_v44 }
  0x1f   :  { %477 = vmatprep.subr.bf16.mxu0 %v514_v2 }
  0x21   :  { %461 = vmatpush3.bf16.msra.mxu1 %v460_v29 }
  0x22   :  { %479 = vmatpush3.bf16.msra.mxu0 %v478_v47 }
  0x23   :  { %480 = vmatprep.subr.bf16.mxu0 %v514_v2 }
  0x26   :  { %482 = vmatpush3.bf16.msra.mxu0 %v481_v56 }
  0x27   :  { %483 = vmatprep.subr.bf16.mxu0 %v514_v2  ;;  %v320_v2 = vld [vmem:[%s710_s6] ss:$0 sm:$0xff] }
  0x2a   :  { %485 = vmatpush3.bf16.msra.mxu0 %v484_v59 }
  0xda   :  { %v107_v49 = vpop.f32.mrb[0].mxu0 }
  0xdb   :  { %v108_v50 = vadd.f32 %v317_v48, %v107_v49  ;;  %v364_v51 = vpop.f32.mrb[1].mxu0 }
  0xdd   :  { %v111_v52 = vmul.f32 0.2, %v108_v50 }
  0xdf   :  { %v112_v53 = vmax.f32 %v108_v50, %v111_v52 }
  0xe1   :  { %398 = vmatmul.mubr.f32.vlgmr.msra.gmra.mrb[0].mxu1 %v112_v53 }
 0x1b4   :  { %v202_v61 = vpop.f32.mrb[0].mxu1 }
 0x1b5   :  { %v203_v62 = vadd.f32 %v319_v60, %v202_v61  ;;  %v399_v63 = vpop.f32.mrb[1].mxu1 }
 0x1b7   :  { %v206_v0 = vmul.f32 0.2, %v203_v62 }
 0x1b9   :  { %v207_v1 = vmax.f32 %v203_v62, %v206_v0 }
 0x1bb   :  { %433 = vmatmul.mubr.f32.vlgmr.msra.gmra.mrb[2].mxu0 %v207_v1 }
 0x28e   :  { %v297_v3 = vpop.f32.mrb[2].mxu0 }
 0x28f   :  { %v298_v4 = vadd.f32 %v320_v2, %v297_v3  ;;  %v434_v5 = vpop.f32.mrb[3].mxu0 }
 0x291   :  { %302 = vst.msk [vmem:[#allocation2] sm:$0xff] %vm301_vm2, %v298_v4 }
 0x292   :  { %501 = shalt.err (!%p498_p4)
}
 0x293   :  { %s502_s25 = scalar_lea.hbm %s711_s7, 128 }
 0x294   :  { %p503_p5 = scmp.ne.s32.totalorder %s711_s7, %s502_s25  ;;  %p506_p6 = scmp.lt.u32.totalorder %s502_s25, %s711_s7 }
 0x296   :  { %p508_p7 = pnand %p506_p6, %p503_p5 }
 0x298   :  { %511 = shalt.err (!%p508_p7)
}
 0x299   :  { %312 = dma.vmem_to_hbm [thread:$0]  %s310_s23, 128, %s711_s7, [#allocation3]  }
 0x29a   :  { %512 = dma.done.wait [#allocation3], 128  }
 0x29b   :  { %513 = vsyncadd [#allocation3], 4294967168 }
 0x29c   :  { %316 = vsyncpa [#allocation3], 1 }

// kernel: tpu_custom_call.1
= control target key start
LH: loop header
LB: loop body
LE: loop exit
PB: predicated region body
PF: predicated region fallthrough
CT: control target
= control target key end

     0   :  { %v514_v2 = vmov 0.0|0.0   ;;  %vm515_vm0 = vmmov 0   ;;  %v516_v4 = vmov 0.0   ;;  %vm37_vm1 = vcmask 130048   ;;  %s704_s0 = inlined_call_operand.vmem [shape: f32[8,16], index: 0, kind: input, shape index: {}]   ;;  %s705_s1 = inlined_call_operand.vmem [shape: f32[16,128], index: 1, kind: input, shape index: {}]   ;;  %s706_s2 = inlined_call_operand.vmem [shape: f32[1,128], index: 2, kind: input, shape index: {}]   ;;  %s707_s3 = inlined_call_operand.vmem [shape: f32[128,128], index: 3, kind: input, shape index: {}]   ;;  %s708_s4 = inlined_call_operand.vmem [shape: f32[1,128], index: 4, kind: input, shape index: {}]   ;;  %s709_s5 = inlined_call_operand.vmem [shape: f32[128,64], index: 5, kind: input, shape index: {}]   ;;  %s710_s6 = inlined_call_operand.vmem [shape: f32[1,64], index: 6, kind: input, shape index: {}]   ;;  %s711_s7 = inlined_call_operand.hbm [shape: f32[8,64], index: 7, kind: output, shape index: {}]  }
   0x1   :  { %v28_v0 = vld [vmem:[%s705_s1] sm:$0xff]  ;;  %v29_v1 = vld [vmem:[%s705_s1 + $0x8] sm:$0xff]  ;;  %435 = vmatprep.subr.bf16.mxu0 %v514_v2  ;;  %362 = vmatprep.mubr.msk.f32.mxu0 %vm515_vm0, %v516_v4  ;;  %v115_v7 = vld [vmem:[%s707_s3 + $0x10] sm:$0xff] }
   0x2   :  { %v436_v3 = vpack.c.bf16 %v29_v1, %v28_v0  ;;  %v113_v5 = vld [vmem:[%s707_s3] sm:$0xff]  ;;  %v114_v6 = vld [vmem:[%s707_s3 + $0x8] sm:$0xff]  ;;  %438 = vmatprep.subr.bf16.mxu1 %v514_v2  ;;  %v116_v9 = vld [vmem:[%s707_s3 + $0x18] sm:$0xff]  ;;  %397 = vmatprep.mubr.msk.f32.mxu1 %vm515_vm0, %v516_v4 }
   0x3   :  { %v439_v8 = vpack.c.bf16 %v114_v6, %v113_v5  ;;  %v27_v10 = vld [vmem:[%s704_s0] sm:$0xff]  ;;  %v442_v11 = vpack.c.bf16 %v116_v9, %v115_v7  ;;  %v118_v13 = vld [vmem:[%s707_s3 + $0x28] sm:$0xff] }
   0x4   :  { %437 = vmatpush3.bf16.msra.mxu0 %v436_v3  ;;  %v117_v12 = vld [vmem:[%s707_s3 + $0x20] sm:$0xff] }
   0x5   :  { %440 = vmatpush3.bf16.msra.mxu1 %v439_v8  ;;  %462 = vmatprep.subr.bf16.mxu0 %v514_v2 }
   0x6   :  { %441 = vmatprep.subr.bf16.mxu1 %v514_v2 }
   0x7   :  { %12 = vsyncpa [#allocation3], 0  ;;  %363 = vmatmul.mubr.msk.f32.vlgmr.msra.gmra.mrb[0].mxu0 %vm37_vm1, %v27_v10  ;;  %v445_v14 = vpack.c.bf16 %v118_v13, %v117_v12  ;;  %v119_v15 = vld [vmem:[%s707_s3 + $0x30] sm:$0xff]  ;;  %v120_v16 = vld [vmem:[%s707_s3 + $0x38] sm:$0xff]  ;;  %s517_s22 = smov [#allocation2]   ;;  %vm301_vm2 = vcmask 523264  }
   0x8   :  { %432 = vmatprep.mubr.msk.f32.mxu0 %vm515_vm0, %v516_v4  ;;  %v448_v17 = vpack.c.bf16 %v120_v16, %v119_v15  ;;  %v121_v18 = vld [vmem:[%s707_s3 + $0x40] sm:$0xff]  ;;  %v122_v19 = vld [vmem:[%s707_s3 + $0x48] sm:$0xff]  ;;  %v123_v21 = vld [vmem:[%s707_s3 + $0x50] sm:$0xff]  ;;  %s309_s23 = sshll.u32 %s517_s22, 4  ;;  %s310_s23 = int_to_ptr.vmem [resolvable:$true] %s309_s23 }
   0x9   :  { %443 = vmatpush3.bf16.msra.mxu1 %v442_v11  ;;  %v451_v20 = vpack.c.bf16 %v122_v19, %v121_v18  ;;  %v124_v22 = vld [vmem:[%s707_s3 + $0x58] sm:$0xff]  ;;  %v125_v24 = vld [vmem:[%s707_s3 + $0x60] sm:$0xff]  ;;  %v126_v25 = vld [vmem:[%s707_s3 + $0x68] sm:$0xff]  ;;  %p495_p1 = scmp.lt.s32.totalorder %s310_s23, %s310_s23 }
   0xa   :  { %444 = vmatprep.subr.bf16.mxu1 %v514_v2  ;;  %v454_v23 = vpack.c.bf16 %v124_v22, %v123_v21  ;;  %v457_v26 = vpack.c.bf16 %v126_v25, %v125_v24  ;;  %v127_v27 = vld [vmem:[%s707_s3 + $0x70] sm:$0xff]  ;;  %v128_v28 = vld [vmem:[%s707_s3 + $0x78] sm:$0xff]  ;;  %v208_v30 = vld [vmem:[%s709_s5] sm:$0xff] }
   0xb   :  { %v460_v29 = vpack.c.bf16 %v128_v28, %v127_v27  ;;  %v209_v31 = vld [vmem:[%s709_s5 + $0x8] sm:$0xff]  ;;  %v210_v32 = vld [vmem:[%s709_s5 + $0x10] sm:$0xff]  ;;  %v211_v34 = vld [vmem:[%s709_s5 + $0x18] sm:$0xff] }
   0xc   :  { %v463_v33 = vpack.c.bf16 %v209_v31, %v208_v30  ;;  %v466_v35 = vpack.c.bf16 %v211_v34, %v210_v32  ;;  %v212_v36 = vld [vmem:[%s709_s5 + $0x20] sm:$0xff]  ;;  %v213_v37 = vld [vmem:[%s709_s5 + $0x28] sm:$0xff]  ;;  %v214_v39 = vld [vmem:[%s709_s5 + $0x30] sm:$0xff] }
   0xd   :  { %446 = vmatpush3.bf16.msra.mxu1 %v445_v14  ;;  %v469_v38 = vpack.c.bf16 %v213_v37, %v212_v36  ;;  %v215_v40 = vld [vmem:[%s709_s5 + $0x38] sm:$0xff]  ;;  %v216_v42 = vld [vmem:[%s709_s5 + $0x40] sm:$0xff]  ;;  %v217_v43 = vld [vmem:[%s709_s5 + $0x48] sm:$0xff] }
   0xe   :  { %447 = vmatprep.subr.bf16.mxu1 %v514_v2  ;;  %464 = vmatpush3.bf16.msra.mxu0 %v463_v33  ;;  %v472_v41 = vpack.c.bf16 %v215_v40, %v214_v39  ;;  %v475_v44 = vpack.c.bf16 %v217_v43, %v216_v42  ;;  %v218_v45 = vld [vmem:[%s709_s5 + $0x50] sm:$0xff]  ;;  %v219_v46 = vld [vmem:[%s709_s5 + $0x58] sm:$0xff]  ;;  %v317_v48 = vld [vmem:[%s706_s2] ss:$0 sm:$0xff] }
   0xf   :  { %465 = vmatprep.subr.bf16.mxu0 %v514_v2  ;;  %v478_v47 = vpack.c.bf16 %v219_v46, %v218_v45  ;;  %v220_v54 = vld [vmem:[%s709_s5 + $0x60] sm:$0xff]  ;;  %v221_v55 = vld [vmem:[%s709_s5 + $0x68] sm:$0xff]  ;;  %v222_v57 = vld [vmem:[%s709_s5 + $0x70] sm:$0xff] }
  0x10   :  { %v481_v56 = vpack.c.bf16 %v221_v55, %v220_v54  ;;  %v223_v58 = vld [vmem:[%s709_s5 + $0x78] sm:$0xff]  ;;  %v319_v60 = vld [vmem:[%s708_s4] ss:$0 sm:$0xff]  ;;  %s490_s5 = scalar_lea.vmem %s310_s23, 128 }
  0x11   :  { %449 = vmatpush3.bf16.msra.mxu1 %v448_v17  ;;  %v484_v59 = vpack.c.bf16 %v223_v58, %v222_v57  ;;  %p491_p0 = scmp.ne.s32.totalorder %s310_s23, %s490_s5  ;;  %p496_p2 = scmp.lt.s32.totalorder %s490_s5, %s490_s5 }
  0x12   :  { %450 = vmatprep.subr.bf16.mxu1 %v514_v2  ;;  %467 = vmatpush3.bf16.msra.mxu0 %v466_v35 }
  0x13   :  { %468 = vmatprep.subr.bf16.mxu0 %v514_v2  ;;  %p497_p3 = por %p496_p2, %p495_p1 }
  0x15   :  { %452 = vmatpush3.bf16.msra.mxu1 %v451_v20  ;;  %p498_p4 = pnand %p497_p3, %p491_p0 }
  0x16   :  { %453 = vmatprep.subr.bf16.mxu1 %v514_v2  ;;  %470 = vmatpush3.bf16.msra.mxu0 %v469_v38 }
  0x17   :  { %471 = vmatprep.subr.bf16.mxu0 %v514_v2 }
  0x19   :  { %455 = vmatpush3.bf16.msra.mxu1 %v454_v23 }
  0x1a   :  { %456 = vmatprep.subr.bf16.mxu1 %v514_v2  ;;  %473 = vmatpush3.bf16.msra.mxu0 %v472_v41 }
  0x1b   :  { %474 = vmatprep.subr.bf16.mxu0 %v514_v2 }
  0x1d   :  { %458 = vmatpush3.bf16.msra.mxu1 %v457_v26 }
  0x1e   :  { %459 = vmatprep.subr.bf16.mxu1 %v514_v2  ;;  %476 = vmatpush3.bf16.msra.mxu0 %v475_v44 }
  0x1f   :  { %477 = vmatprep.subr.bf16.mxu0 %v514_v2 }
  0x21   :  { %461 = vmatpush3.bf16.msra.mxu1 %v460_v29 }
  0x22   :  { %479 = vmatpush3.bf16.msra.mxu0 %v478_v47 }
  0x23   :  { %480 = vmatprep.subr.bf16.mxu0 %v514_v2 }
  0x26   :  { %482 = vmatpush3.bf16.msra.mxu0 %v481_v56 }
  0x27   :  { %483 = vmatprep.subr.bf16.mxu0 %v514_v2  ;;  %v320_v2 = vld [vmem:[%s710_s6] ss:$0 sm:$0xff] }
  0x2a   :  { %485 = vmatpush3.bf16.msra.mxu0 %v484_v59 }
  0xda   :  { %v107_v49 = vpop.f32.mrb[0].mxu0 }
  0xdb   :  { %v108_v50 = vadd.f32 %v317_v48, %v107_v49  ;;  %v364_v51 = vpop.f32.mrb[1].mxu0 }
  0xdd   :  { %v111_v52 = vmul.f32 0.2, %v108_v50 }
  0xdf   :  { %v112_v53 = vmax.f32 %v108_v50, %v111_v52 }
  0xe1   :  { %398 = vmatmul.mubr.f32.vlgmr.msra.gmra.mrb[0].mxu1 %v112_v53 }
 0x1b4   :  { %v202_v61 = vpop.f32.mrb[0].mxu1 }
 0x1b5   :  { %v203_v62 = vadd.f32 %v319_v60, %v202_v61  ;;  %v399_v63 = vpop.f32.mrb[1].mxu1 }
 0x1b7   :  { %v206_v0 = vmul.f32 0.2, %v203_v62 }
 0x1b9   :  { %v207_v1 = vmax.f32 %v203_v62, %v206_v0 }
 0x1bb   :  { %433 = vmatmul.mubr.f32.vlgmr.msra.gmra.mrb[2].mxu0 %v207_v1 }
 0x28e   :  { %v297_v3 = vpop.f32.mrb[2].mxu0 }
 0x28f   :  { %v298_v4 = vadd.f32 %v320_v2, %v297_v3  ;;  %v434_v5 = vpop.f32.mrb[3].mxu0 }
 0x291   :  { %302 = vst.msk [vmem:[#allocation2] sm:$0xff] %vm301_vm2, %v298_v4 }
 0x292   :  { %501 = shalt.err (!%p498_p4)
}
 0x293   :  { %s502_s25 = scalar_lea.hbm %s711_s7, 128 }
 0x294   :  { %p503_p5 = scmp.ne.s32.totalorder %s711_s7, %s502_s25  ;;  %p506_p6 = scmp.lt.u32.totalorder %s502_s25, %s711_s7 }
 0x296   :  { %p508_p7 = pnand %p506_p6, %p503_p5 }
 0x298   :  { %511 = shalt.err (!%p508_p7)
}
 0x299   :  { %312 = dma.vmem_to_hbm [thread:$0]  %s310_s23, 128, %s711_s7, [#allocation3]  }
 0x29a   :  { %512 = dma.done.wait [#allocation3], 128  }
 0x29b   :  { %513 = vsyncadd [#allocation3], 4294967168 }
 0x29c   :  { %316 = vsyncpa [#allocation3], 1 }

</bundles_post_ra>
